<compile_context>
chip_gen: v7x
topology: tpu7x:2x2x1
jax: 0.10.0
libtpu: 0.0.40
codegen_flags: <defaults>
</compile_context>

<pallas_src>
import numpy as np

import jax
import jax.numpy as jnp
from jax.experimental import pallas as pl
from jax.experimental.pallas import tpu as pltpu

CONFIG = dict(
    use_feature_normalization=True,
    use_conv1d=True,
    use_orthogonal=False,
    use_ReLU=True,
    stacked_frames=4,
    inputs_dim=16,      # per-frame feature dim (config['inputs_dim'])
    hidden_size=32,
    layer_N=1,
)
EPS = 1e-5  # PyTorch nn.LayerNorm default


# --------------------------- fused Pallas kernel ---------------------------

def _make_fused_kernel(n_conv, n_fc, use_feature_norm):
    """Build the fused forward kernel for a fixed layer layout."""

    def kernel(*refs):
        idx = 0
        x_ref = refs[idx]; idx += 1
        if use_feature_norm:
            fn_g_ref, fn_b_ref = refs[idx], refs[idx + 1]; idx += 2
        conv_refs = []
        for _ in range(n_conv):
            conv_refs.append((refs[idx], refs[idx + 1])); idx += 2
        fc_refs = []
        for _ in range(n_fc):
            fc_refs.append((refs[idx], refs[idx + 1], refs[idx + 2], refs[idx + 3]))
            idx += 4
        o_ref = refs[idx]

        x = x_ref[...].astype(jnp.float32)

        # feature_norm = nn.LayerNorm(flat_in)
        if use_feature_norm:
            m = jnp.mean(x, axis=-1, keepdims=True)
            v = jnp.mean((x - m) ** 2, axis=-1, keepdims=True)
            x = (x - m) * jax.lax.rsqrt(v + EPS) * fn_g_ref[...] + fn_b_ref[...]

        # CONVLayer: each Conv1d+ReLU folded to (flat @ W_dense + b_dense), ReLU
        for (w_ref, b_ref) in conv_refs:
            x = jnp.dot(x, w_ref[...], preferred_element_type=jnp.float32)
            x = jnp.maximum(x + b_ref[...], 0.0)

        # MLPLayer: fc1 then layer_N clones of fc_h  (Linear + ReLU + LayerNorm)
        for (w_ref, b_ref, g_ref, beta_ref) in fc_refs:
            y = jnp.dot(x, w_ref[...], preferred_element_type=jnp.float32)
            y = jnp.maximum(y + b_ref[...], 0.0)
            m = jnp.mean(y, axis=-1, keepdims=True)
            v = jnp.mean((y - m) ** 2, axis=-1, keepdims=True)
            x = (y - m) * jax.lax.rsqrt(v + EPS) * g_ref[...] + beta_ref[...]

        o_ref[...] = x.astype(o_ref.dtype)

    return kernel


def mlp_base_forward(params, x, cfg, *, max_tile_b=256):
    """Fused MLPBase forward: one pallas_call, batch-gridded when B is large."""
    B, F = x.shape
    H = cfg['hidden_size']

    # Batch tiling: big batches get a grid (weights VMEM-resident, activations
    # double-buffered); small batches use a single whole-array block.
    if B >= max_tile_b:
        tile_b = max_tile_b
        b_pad = -(-B // tile_b) * tile_b
    else:
        b_pad = max(8, -(-B // 8) * 8)          # keep sublane alignment
        tile_b = b_pad
    if b_pad != B:
        x = jnp.pad(x, ((0, b_pad - B), (0, 0)))
    grid = (b_pad // tile_b,)

    operands = [x]
    in_specs = [pl.BlockSpec((tile_b, F), lambda i: (i, 0))]

    def add_param(p):
        p2 = p if p.ndim == 2 else p.reshape(1, -1)   # biases/gamma/beta as (1, N)
        operands.append(p2)
        # constant index_map -> parameter block fetched once, stays in VMEM
        in_specs.append(pl.BlockSpec(p2.shape, lambda i: (0, 0)))

    if cfg['use_feature_normalization']:
        add_param(params['fn_g'])
        add_param(params['fn_b'])

    n_conv = 0
    if cfg['use_conv1d']:
        for (w_dense, b_dense) in params['conv_dense']:
            add_param(w_dense)
            add_param(b_dense)
            n_conv += 1

    for (w, b, g, beta) in params['fc']:
        add_param(w)
        add_param(b)
        add_param(g)
        add_param(beta)

    kernel = _make_fused_kernel(n_conv, len(params['fc']),
                                cfg['use_feature_normalization'])

    out = pl.pallas_call(
        kernel,
        out_shape=jax.ShapeDtypeStruct((b_pad, H), x.dtype),
        grid=grid,
        in_specs=in_specs,
        out_specs=pl.BlockSpec((tile_b, H), lambda i: (i, 0)),
        compiler_params=pltpu.CompilerParams(
            dimension_semantics=("parallel",),   # shard batch grid across TCs (v7x)
        ),
    )(*operands)
    return out[:B]


# ---------------------- parameter setup (plain JAX/numpy) -------------------

def conv1d_to_dense(w_oik, bias, L_in, stride, padding):
    """Fold a Conv1d into a dense map on the C-major flattened NCL layout."""
    w = np.asarray(w_oik, dtype=np.float32)
    b = np.asarray(bias, dtype=np.float32)
    C_out, C_in, K = w.shape
    L_out = (L_in + 2 * padding - K) // stride + 1
    W = np.zeros((C_in * L_in, C_out * L_out), dtype=np.float32)
    for co in range(C_out):
        for ci in range(C_in):
            for k in range(K):
                for lo in range(L_out):
                    li = lo * stride + k - padding
                    if 0 <= li < L_in:
                        W[ci * L_in + li, co * L_out + lo] = w[co, ci, k]
    b_dense = np.repeat(b, L_out)                       # bias broadcast over L_out
    return jnp.asarray(W), jnp.asarray(b_dense), L_out


def init_params(key, cfg):
    H = cfg['hidden_size']
    SF = cfg['stacked_frames']
    L = cfg['inputs_dim']
    flat_in = SF * L
    ks = jax.random.split(key, 8)
    p = {}

    # feature_norm : LayerNorm(flat_in)
    p['fn_g'] = jnp.ones((flat_in,), jnp.float32)
    p['fn_b'] = jnp.zeros((flat_in,), jnp.float32)

    # CONVLayer: Conv1d(SF, H//4, k=3, s=2, p=0) / (H//4, H//2, 3, 1, 1)
    #            / (H//2, H, 3, 1, 1), each + ReLU
    conv_defs = [
        (SF, H // 4, 3, 2, 0),
        (H // 4, H // 2, 3, 1, 1),
        (H // 2, H, 3, 1, 1),
    ]
    p['conv_raw'] = []    # original (w, b, stride, pad) — used by the JAX reference
    p['conv_dense'] = []  # dense equivalents consumed by the fused kernel
    L_cur = L
    for i, (ci, co, k, s, pad) in enumerate(conv_defs):
        w = 0.1 * jax.random.normal(ks[i], (co, ci, k), jnp.float32)
        b = jnp.zeros((co,), jnp.float32)
        p['conv_raw'].append((w, b, s, pad))
        W_dense, b_dense, L_cur = conv1d_to_dense(w, b, L_cur, s, pad)
        p['conv_dense'].append((W_dense, b_dense))
    mlp_in = conv_defs[-1][1] * L_cur   # C_out * L_out == random_out flatten dim

    # MLPLayer: fc1 then layer_N identical clones of fc_h
    fc = []
    w1 = 0.1 * jax.random.normal(ks[3], (mlp_in, H), jnp.float32)
    fc.append((w1, jnp.zeros((H,), jnp.float32),
               jnp.ones((H,), jnp.float32), jnp.zeros((H,), jnp.float32)))
    wh = 0.1 * jax.random.normal(ks[4], (H, H), jnp.float32)
    bh = jnp.zeros((H,), jnp.float32)
    gh = jnp.ones((H,), jnp.float32)
    betah = jnp.zeros((H,), jnp.float32)
    for _ in range(cfg['layer_N']):
        fc.append((wh, bh, gh, betah))   # get_clones -> identical copies
    p['fc'] = fc
    return p


# --------------------- pure-JAX reference (for validation) ------------------

def reference_forward(params, x, cfg):
    def layernorm(v, g, b):
        m = jnp.mean(v, -1, keepdims=True)
        var = jnp.mean((v - m) ** 2, -1, keepdims=True)
        return (v - m) * jax.lax.rsqrt(var + EPS) * g + b

    if cfg['use_feature_normalization']:
        x = layernorm(x, params['fn_g'], params['fn_b'])
    if cfg['use_conv1d']:
        B = x.shape[0]
        x = x.reshape(B, cfg['stacked_frames'], -1)          # x.view(B, SF, -1)
        for (w, b, s, pad) in params['conv_raw']:
            C_out, C_in, K = w.shape
            xp = jnp.pad(x, ((0, 0), (0, 0), (pad, pad)))
            L_out = (x.shape[-1] + 2 * pad - K) // s + 1
            patches = jnp.stack(
                [xp[:, :, t * s:t * s + K] for t in range(L_out)], axis=1)
            x = jnp.maximum(
                jnp.einsum('blck,ock->bol', patches, w) + b[None, :, None], 0.0)
        x = x.reshape(B, -1)                                  # C-major flatten (NCL)
    for (w, b, g, beta) in params['fc']:
        x = layernorm(jnp.maximum(x @ w + b, 0.0), g, beta)
    return x


# ----------------------------------- main -----------------------------------

if __name__ == "__main__":
    key = jax.random.PRNGKey(0)
    pkey, xkey = jax.random.split(key)
    params = init_params(pkey, CONFIG)
    flat_in = CONFIG['stacked_frames'] * CONFIG['inputs_dim']   # 4 * 16 = 64

    # Small batch: single fused kernel invocation (whole-array block).
    B = 2
    x = jax.random.normal(xkey, (B, flat_in), jnp.float32)
    out = mlp_base_forward(params, x, CONFIG)
    jax.block_until_ready(out)
    assert out.shape == (B, CONFIG['hidden_size'])
    assert bool(jnp.all(jnp.isfinite(out)))
    ref = reference_forward(params, x, CONFIG)
    assert jnp.allclose(out, ref, rtol=5e-2, atol=5e-2), \
        float(jnp.max(jnp.abs(out - ref)))

    # Larger batch: exercises the batch grid (parallel axis, VMEM-resident weights).
    B2 = 512
    x2 = jax.random.normal(jax.random.PRNGKey(1), (B2, flat_in), jnp.float32)
    out2 = mlp_base_forward(params, x2, CONFIG)
    jax.block_until_ready(out2)
    assert out2.shape == (B2, CONFIG['hidden_size'])
    ref2 = reference_forward(params, x2, CONFIG)
    assert jnp.allclose(out2, ref2, rtol=5e-2, atol=5e-2), \
        float(jnp.max(jnp.abs(out2 - ref2)))

    print("KERNEL_OK")
</pallas_src>

<mosaic_0001>
module attributes {stable_mosaic.version = 11 : i64} {
  func.func @kernel(%arg0: i32, %arg1: memref<8x64xf32, #tpu.memory_space<vmem>>, %arg2: memref<1x64xf32, #tpu.memory_space<vmem>>, %arg3: memref<1x64xf32, #tpu.memory_space<vmem>>, %arg4: memref<64x56xf32, #tpu.memory_space<vmem>>, %arg5: memref<1x56xf32, #tpu.memory_space<vmem>>, %arg6: memref<56x112xf32, #tpu.memory_space<vmem>>, %arg7: memref<1x112xf32, #tpu.memory_space<vmem>>, %arg8: memref<112x224xf32, #tpu.memory_space<vmem>>, %arg9: memref<1x224xf32, #tpu.memory_space<vmem>>, %arg10: memref<224x32xf32, #tpu.memory_space<vmem>>, %arg11: memref<1x32xf32, #tpu.memory_space<vmem>>, %arg12: memref<1x32xf32, #tpu.memory_space<vmem>>, %arg13: memref<1x32xf32, #tpu.memory_space<vmem>>, %arg14: memref<32x32xf32, #tpu.memory_space<vmem>>, %arg15: memref<1x32xf32, #tpu.memory_space<vmem>>, %arg16: memref<1x32xf32, #tpu.memory_space<vmem>>, %arg17: memref<1x32xf32, #tpu.memory_space<vmem>>, %arg18: memref<8x32xf32, #tpu.memory_space<vmem>>) attributes {dimension_semantics = [#tpu.dimension_semantics<parallel>], iteration_bounds = array<i64: 1>, scalar_prefetch = 0 : i64, scratch_operands = 0 : i64, tpu.core_type = #tpu.core_type<tc>, window_params = [{transform_indices = @transform_0, window_bounds = array<i64: 8, 64>}, {pipeline_mode = #tpu.pipeline_mode<synchronous>, transform_indices = @transform_1, window_bounds = array<i64: 1, 64>}, {pipeline_mode = #tpu.pipeline_mode<synchronous>, transform_indices = @transform_2, window_bounds = array<i64: 1, 64>}, {pipeline_mode = #tpu.pipeline_mode<synchronous>, transform_indices = @transform_3, window_bounds = array<i64: 64, 56>}, {pipeline_mode = #tpu.pipeline_mode<synchronous>, transform_indices = @transform_4, window_bounds = array<i64: 1, 56>}, {pipeline_mode = #tpu.pipeline_mode<synchronous>, transform_indices = @transform_5, window_bounds = array<i64: 56, 112>}, {pipeline_mode = #tpu.pipeline_mode<synchronous>, transform_indices = @transform_6, window_bounds = array<i64: 1, 112>}, {pipeline_mode = #tpu.pipeline_mode<synchronous>, transform_indices = @transform_7, window_bounds = array<i64: 112, 224>}, {pipeline_mode = #tpu.pipeline_mode<synchronous>, transform_indices = @transform_8, window_bounds = array<i64: 1, 224>}, {pipeline_mode = #tpu.pipeline_mode<synchronous>, transform_indices = @transform_9, window_bounds = array<i64: 224, 32>}, {pipeline_mode = #tpu.pipeline_mode<synchronous>, transform_indices = @transform_10, window_bounds = array<i64: 1, 32>}, {pipeline_mode = #tpu.pipeline_mode<synchronous>, transform_indices = @transform_11, window_bounds = array<i64: 1, 32>}, {pipeline_mode = #tpu.pipeline_mode<synchronous>, transform_indices = @transform_12, window_bounds = array<i64: 1, 32>}, {pipeline_mode = #tpu.pipeline_mode<synchronous>, transform_indices = @transform_13, window_bounds = array<i64: 32, 32>}, {pipeline_mode = #tpu.pipeline_mode<synchronous>, transform_indices = @transform_14, window_bounds = array<i64: 1, 32>}, {pipeline_mode = #tpu.pipeline_mode<synchronous>, transform_indices = @transform_15, window_bounds = array<i64: 1, 32>}, {pipeline_mode = #tpu.pipeline_mode<synchronous>, transform_indices = @transform_16, window_bounds = array<i64: 1, 32>}, {transform_indices = @transform_17, window_bounds = array<i64: 8, 32>}]} {
    %c0 = arith.constant 0 : index
    %c0_0 = arith.constant 0 : index
    %0 = vector.load %arg1[%c0, %c0_0] : memref<8x64xf32, #tpu.memory_space<vmem>>, vector<8x64xf32>
    %cst = arith.constant dense<0.000000e+00> : vector<8xf32>
    %1 = vector.multi_reduction <add>, %0, %cst [1] : vector<8x64xf32> to vector<8xf32>
    %2 = vector.shape_cast %1 : vector<8xf32> to vector<8x1xf32>
    %cst_1 = arith.constant 6.400000e+01 : f32
    %3 = vector.broadcast %cst_1 : f32 to vector<8x1xf32>
    %4 = arith.divf %2, %3 : vector<8x1xf32>
    %5 = vector.broadcast %4 : vector<8x1xf32> to vector<8x64xf32>
    %6 = arith.subf %0, %5 : vector<8x64xf32>
    %7 = arith.mulf %6, %6 : vector<8x64xf32>
    %cst_2 = arith.constant dense<0.000000e+00> : vector<8xf32>
    %8 = vector.multi_reduction <add>, %7, %cst_2 [1] : vector<8x64xf32> to vector<8xf32>
    %9 = vector.shape_cast %8 : vector<8xf32> to vector<8x1xf32>
    %cst_3 = arith.constant 6.400000e+01 : f32
    %10 = vector.broadcast %cst_3 : f32 to vector<8x1xf32>
    %11 = arith.divf %9, %10 : vector<8x1xf32>
    %12 = vector.broadcast %4 : vector<8x1xf32> to vector<8x64xf32>
    %13 = arith.subf %0, %12 : vector<8x64xf32>
    %cst_4 = arith.constant 9.99999974E-6 : f32
    %14 = vector.broadcast %cst_4 : f32 to vector<8x1xf32>
    %15 = arith.addf %11, %14 : vector<8x1xf32>
    %16 = math.rsqrt %15 : vector<8x1xf32>
    %17 = vector.broadcast %16 : vector<8x1xf32> to vector<8x64xf32>
    %18 = arith.mulf %13, %17 : vector<8x64xf32>
    %c0_5 = arith.constant 0 : index
    %c0_6 = arith.constant 0 : index
    %19 = vector.load %arg2[%c0_5, %c0_6] : memref<1x64xf32, #tpu.memory_space<vmem>>, vector<1x64xf32>
    %20 = vector.broadcast %19 : vector<1x64xf32> to vector<8x64xf32>
    %21 = arith.mulf %18, %20 : vector<8x64xf32>
    %c0_7 = arith.constant 0 : index
    %c0_8 = arith.constant 0 : index
    %22 = vector.load %arg3[%c0_7, %c0_8] : memref<1x64xf32, #tpu.memory_space<vmem>>, vector<1x64xf32>
    %23 = vector.broadcast %22 : vector<1x64xf32> to vector<8x64xf32>
    %24 = arith.addf %21, %23 : vector<8x64xf32>
    %c0_9 = arith.constant 0 : index
    %c0_10 = arith.constant 0 : index
    %25 = vector.load %arg4[%c0_9, %c0_10] : memref<64x56xf32, #tpu.memory_space<vmem>>, vector<64x56xf32>
    %cst_11 = arith.constant dense<0.000000e+00> : vector<8x56xf32>
    %26 = tpu.matmul %24, %25, %cst_11 {dimension_numbers = #tpu.dot_dimension_numbers<[1], [0], [0], [1], [0, 0, 1, 1], [], []>} : vector<8x64xf32>, vector<64x56xf32>, vector<8x56xf32> -> vector<8x56xf32>
    %c0_12 = arith.constant 0 : index
    %c0_13 = arith.constant 0 : index
    %27 = vector.load %arg5[%c0_12, %c0_13] : memref<1x56xf32, #tpu.memory_space<vmem>>, vector<1x56xf32>
    %28 = vector.broadcast %27 : vector<1x56xf32> to vector<8x56xf32>
    %29 = arith.addf %26, %28 : vector<8x56xf32>
    %cst_14 = arith.constant 0.000000e+00 : f32
    %30 = vector.broadcast %cst_14 : f32 to vector<8x56xf32>
    %31 = arith.maximumf %29, %30 : vector<8x56xf32>
    %c0_15 = arith.constant 0 : index
    %c0_16 = arith.constant 0 : index
    %32 = vector.load %arg6[%c0_15, %c0_16] : memref<56x112xf32, #tpu.memory_space<vmem>>, vector<56x112xf32>
    %cst_17 = arith.constant dense<0.000000e+00> : vector<8x112xf32>
    %33 = tpu.matmul %31, %32, %cst_17 {dimension_numbers = #tpu.dot_dimension_numbers<[1], [0], [0], [1], [0, 0, 1, 1], [], []>} : vector<8x56xf32>, vector<56x112xf32>, vector<8x112xf32> -> vector<8x112xf32>
    %c0_18 = arith.constant 0 : index
    %c0_19 = arith.constant 0 : index
    %34 = vector.load %arg7[%c0_18, %c0_19] : memref<1x112xf32, #tpu.memory_space<vmem>>, vector<1x112xf32>
    %35 = vector.broadcast %34 : vector<1x112xf32> to vector<8x112xf32>
    %36 = arith.addf %33, %35 : vector<8x112xf32>
    %cst_20 = arith.constant 0.000000e+00 : f32
    %37 = vector.broadcast %cst_20 : f32 to vector<8x112xf32>
    %38 = arith.maximumf %36, %37 : vector<8x112xf32>
    %c0_21 = arith.constant 0 : index
    %c0_22 = arith.constant 0 : index
    %39 = vector.load %arg8[%c0_21, %c0_22] : memref<112x224xf32, #tpu.memory_space<vmem>>, vector<112x224xf32>
    %cst_23 = arith.constant dense<0.000000e+00> : vector<8x224xf32>
    %40 = tpu.matmul %38, %39, %cst_23 {dimension_numbers = #tpu.dot_dimension_numbers<[1], [0], [0], [1], [0, 0, 1, 1], [], []>} : vector<8x112xf32>, vector<112x224xf32>, vector<8x224xf32> -> vector<8x224xf32>
    %c0_24 = arith.constant 0 : index
    %c0_25 = arith.constant 0 : index
    %41 = vector.load %arg9[%c0_24, %c0_25] : memref<1x224xf32, #tpu.memory_space<vmem>>, vector<1x224xf32>
    %42 = vector.broadcast %41 : vector<1x224xf32> to vector<8x224xf32>
    %43 = arith.addf %40, %42 : vector<8x224xf32>
    %cst_26 = arith.constant 0.000000e+00 : f32
    %44 = vector.broadcast %cst_26 : f32 to vector<8x224xf32>
    %45 = arith.maximumf %43, %44 : vector<8x224xf32>
    %c0_27 = arith.constant 0 : index
    %c0_28 = arith.constant 0 : index
    %46 = vector.load %arg10[%c0_27, %c0_28] : memref<224x32xf32, #tpu.memory_space<vmem>>, vector<224x32xf32>
    %cst_29 = arith.constant dense<0.000000e+00> : vector<8x32xf32>
    %47 = tpu.matmul %45, %46, %cst_29 {dimension_numbers = #tpu.dot_dimension_numbers<[1], [0], [0], [1], [0, 0, 1, 1], [], []>} : vector<8x224xf32>, vector<224x32xf32>, vector<8x32xf32> -> vector<8x32xf32>
    %c0_30 = arith.constant 0 : index
    %c0_31 = arith.constant 0 : index
    %48 = vector.load %arg11[%c0_30, %c0_31] : memref<1x32xf32, #tpu.memory_space<vmem>>, vector<1x32xf32>
    %49 = vector.broadcast %48 : vector<1x32xf32> to vector<8x32xf32>
    %50 = arith.addf %47, %49 : vector<8x32xf32>
    %cst_32 = arith.constant 0.000000e+00 : f32
    %51 = vector.broadcast %cst_32 : f32 to vector<8x32xf32>
    %52 = arith.maximumf %50, %51 : vector<8x32xf32>
    %cst_33 = arith.constant dense<0.000000e+00> : vector<8xf32>
    %53 = vector.multi_reduction <add>, %52, %cst_33 [1] : vector<8x32xf32> to vector<8xf32>
    %54 = vector.shape_cast %53 : vector<8xf32> to vector<8x1xf32>
    %cst_34 = arith.constant 3.200000e+01 : f32
    %55 = vector.broadcast %cst_34 : f32 to vector<8x1xf32>
    %56 = arith.divf %54, %55 : vector<8x1xf32>
    %57 = vector.broadcast %56 : vector<8x1xf32> to vector<8x32xf32>
    %58 = arith.subf %52, %57 : vector<8x32xf32>
    %59 = arith.mulf %58, %58 : vector<8x32xf32>
    %cst_35 = arith.constant dense<0.000000e+00> : vector<8xf32>
    %60 = vector.multi_reduction <add>, %59, %cst_35 [1] : vector<8x32xf32> to vector<8xf32>
    %61 = vector.shape_cast %60 : vector<8xf32> to vector<8x1xf32>
    %cst_36 = arith.constant 3.200000e+01 : f32
    %62 = vector.broadcast %cst_36 : f32 to vector<8x1xf32>
    %63 = arith.divf %61, %62 : vector<8x1xf32>
    %64 = vector.broadcast %56 : vector<8x1xf32> to vector<8x32xf32>
    %65 = arith.subf %52, %64 : vector<8x32xf32>
    %cst_37 = arith.constant 9.99999974E-6 : f32
    %66 = vector.broadcast %cst_37 : f32 to vector<8x1xf32>
    %67 = arith.addf %63, %66 : vector<8x1xf32>
    %68 = math.rsqrt %67 : vector<8x1xf32>
    %69 = vector.broadcast %68 : vector<8x1xf32> to vector<8x32xf32>
    %70 = arith.mulf %65, %69 : vector<8x32xf32>
    %c0_38 = arith.constant 0 : index
    %c0_39 = arith.constant 0 : index
    %71 = vector.load %arg12[%c0_38, %c0_39] : memref<1x32xf32, #tpu.memory_space<vmem>>, vector<1x32xf32>
    %72 = vector.broadcast %71 : vector<1x32xf32> to vector<8x32xf32>
    %73 = arith.mulf %70, %72 : vector<8x32xf32>
    %c0_40 = arith.constant 0 : index
    %c0_41 = arith.constant 0 : index
    %74 = vector.load %arg13[%c0_40, %c0_41] : memref<1x32xf32, #tpu.memory_space<vmem>>, vector<1x32xf32>
    %75 = vector.broadcast %74 : vector<1x32xf32> to vector<8x32xf32>
    %76 = arith.addf %73, %75 : vector<8x32xf32>
    %c0_42 = arith.constant 0 : index
    %c0_43 = arith.constant 0 : index
    %77 = vector.load %arg14[%c0_42, %c0_43] : memref<32x32xf32, #tpu.memory_space<vmem>>, vector<32x32xf32>
    %cst_44 = arith.constant dense<0.000000e+00> : vector<8x32xf32>
    %78 = tpu.matmul %76, %77, %cst_44 {dimension_numbers = #tpu.dot_dimension_numbers<[1], [0], [0], [1], [0, 0, 1, 1], [], []>} : vector<8x32xf32>, vector<32x32xf32>, vector<8x32xf32> -> vector<8x32xf32>
    %c0_45 = arith.constant 0 : index
    %c0_46 = arith.constant 0 : index
    %79 = vector.load %arg15[%c0_45, %c0_46] : memref<1x32xf32, #tpu.memory_space<vmem>>, vector<1x32xf32>
    %80 = vector.broadcast %79 : vector<1x32xf32> to vector<8x32xf32>
    %81 = arith.addf %78, %80 : vector<8x32xf32>
    %cst_47 = arith.constant 0.000000e+00 : f32
    %82 = vector.broadcast %cst_47 : f32 to vector<8x32xf32>
    %83 = arith.maximumf %81, %82 : vector<8x32xf32>
    %cst_48 = arith.constant dense<0.000000e+00> : vector<8xf32>
    %84 = vector.multi_reduction <add>, %83, %cst_48 [1] : vector<8x32xf32> to vector<8xf32>
    %85 = vector.shape_cast %84 : vector<8xf32> to vector<8x1xf32>
    %cst_49 = arith.constant 3.200000e+01 : f32
    %86 = vector.broadcast %cst_49 : f32 to vector<8x1xf32>
    %87 = arith.divf %85, %86 : vector<8x1xf32>
    %88 = vector.broadcast %87 : vector<8x1xf32> to vector<8x32xf32>
    %89 = arith.subf %83, %88 : vector<8x32xf32>
    %90 = arith.mulf %89, %89 : vector<8x32xf32>
    %cst_50 = arith.constant dense<0.000000e+00> : vector<8xf32>
    %91 = vector.multi_reduction <add>, %90, %cst_50 [1] : vector<8x32xf32> to vector<8xf32>
    %92 = vector.shape_cast %91 : vector<8xf32> to vector<8x1xf32>
    %cst_51 = arith.constant 3.200000e+01 : f32
    %93 = vector.broadcast %cst_51 : f32 to vector<8x1xf32>
    %94 = arith.divf %92, %93 : vector<8x1xf32>
    %95 = vector.broadcast %87 : vector<8x1xf32> to vector<8x32xf32>
    %96 = arith.subf %83, %95 : vector<8x32xf32>
    %cst_52 = arith.constant 9.99999974E-6 : f32
    %97 = vector.broadcast %cst_52 : f32 to vector<8x1xf32>
    %98 = arith.addf %94, %97 : vector<8x1xf32>
    %99 = math.rsqrt %98 : vector<8x1xf32>
    %100 = vector.broadcast %99 : vector<8x1xf32> to vector<8x32xf32>
    %101 = arith.mulf %96, %100 : vector<8x32xf32>
    %c0_53 = arith.constant 0 : index
    %c0_54 = arith.constant 0 : index
    %102 = vector.load %arg16[%c0_53, %c0_54] : memref<1x32xf32, #tpu.memory_space<vmem>>, vector<1x32xf32>
    %103 = vector.broadcast %102 : vector<1x32xf32> to vector<8x32xf32>
    %104 = arith.mulf %101, %103 : vector<8x32xf32>
    %c0_55 = arith.constant 0 : index
    %c0_56 = arith.constant 0 : index
    %105 = vector.load %arg17[%c0_55, %c0_56] : memref<1x32xf32, #tpu.memory_space<vmem>>, vector<1x32xf32>
    %106 = vector.broadcast %105 : vector<1x32xf32> to vector<8x32xf32>
    %107 = arith.addf %104, %106 : vector<8x32xf32>
    %c0_57 = arith.constant 0 : index
    %c0_58 = arith.constant 0 : index
    %108 = vector.load %arg18[%c0_57, %c0_58] : memref<8x32xf32, #tpu.memory_space<vmem>>, vector<8x32xf32>
    tpu.vector_store %arg18[%c0_57, %c0_58], %107 {strides = array<i32>} : memref<8x32xf32, #tpu.memory_space<vmem>>, vector<8x32xf32>,
    return
  }
  func.func @transform_0(%arg0: i32) -> (i32, i32) {
    %c0_i32 = arith.constant 0 : i32
    %c0_i32_0 = arith.constant 0 : i32
    return %arg0, %c0_i32 : i32, i32
  }
  func.func @transform_1(%arg0: i32) -> (i32, i32) {
    %c0_i32 = arith.constant 0 : i32
    %c0_i32_0 = arith.constant 0 : i32
    %c0_i32_1 = arith.constant 0 : i32
    return %c0_i32, %c0_i32_0 : i32, i32
  }
  func.func @transform_2(%arg0: i32) -> (i32, i32) {
    %c0_i32 = arith.constant 0 : i32
    %c0_i32_0 = arith.constant 0 : i32
    %c0_i32_1 = arith.constant 0 : i32
    return %c0_i32, %c0_i32_0 : i32, i32
  }
  func.func @transform_3(%arg0: i32) -> (i32, i32) {
    %c0_i32 = arith.constant 0 : i32
    %c0_i32_0 = arith.constant 0 : i32
    %c0_i32_1 = arith.constant 0 : i32
    return %c0_i32, %c0_i32_0 : i32, i32
  }
  func.func @transform_4(%arg0: i32) -> (i32, i32) {
    %c0_i32 = arith.constant 0 : i32
    %c0_i32_0 = arith.constant 0 : i32
    %c0_i32_1 = arith.constant 0 : i32
    return %c0_i32, %c0_i32_0 : i32, i32
  }
  func.func @transform_5(%arg0: i32) -> (i32, i32) {
    %c0_i32 = arith.constant 0 : i32
    %c0_i32_0 = arith.constant 0 : i32
    %c0_i32_1 = arith.constant 0 : i32
    return %c0_i32, %c0_i32_0 : i32, i32
  }
  func.func @transform_6(%arg0: i32) -> (i32, i32) {
    %c0_i32 = arith.constant 0 : i32
    %c0_i32_0 = arith.constant 0 : i32
    %c0_i32_1 = arith.constant 0 : i32
    return %c0_i32, %c0_i32_0 : i32, i32
  }
  func.func @transform_7(%arg0: i32) -> (i32, i32) {
    %c0_i32 = arith.constant 0 : i32
    %c0_i32_0 = arith.constant 0 : i32
    %c0_i32_1 = arith.constant 0 : i32
    return %c0_i32, %c0_i32_0 : i32, i32
  }
  func.func @transform_8(%arg0: i32) -> (i32, i32) {
    %c0_i32 = arith.constant 0 : i32
    %c0_i32_0 = arith.constant 0 : i32
    %c0_i32_1 = arith.constant 0 : i32
    return %c0_i32, %c0_i32_0 : i32, i32
  }
  func.func @transform_9(%arg0: i32) -> (i32, i32) {
    %c0_i32 = arith.constant 0 : i32
    %c0_i32_0 = arith.constant 0 : i32
    %c0_i32_1 = arith.constant 0 : i32
    return %c0_i32, %c0_i32_0 : i32, i32
  }
  func.func @transform_10(%arg0: i32) -> (i32, i32) {
    %c0_i32 = arith.constant 0 : i32
    %c0_i32_0 = arith.constant 0 : i32
    %c0_i32_1 = arith.constant 0 : i32
    return %c0_i32, %c0_i32_0 : i32, i32
  }
  func.func @transform_11(%arg0: i32) -> (i32, i32) {
    %c0_i32 = arith.constant 0 : i32
    %c0_i32_0 = arith.constant 0 : i32
    %c0_i32_1 = arith.constant 0 : i32
    return %c0_i32, %c0_i32_0 : i32, i32
  }
  func.func @transform_12(%arg0: i32) -> (i32, i32) {
    %c0_i32 = arith.constant 0 : i32
    %c0_i32_0 = arith.constant 0 : i32
    %c0_i32_1 = arith.constant 0 : i32
    return %c0_i32, %c0_i32_0 : i32, i32
  }
  func.func @transform_13(%arg0: i32) -> (i32, i32) {
    %c0_i32 = arith.constant 0 : i32
    %c0_i32_0 = arith.constant 0 : i32
    %c0_i32_1 = arith.constant 0 : i32
    return %c0_i32, %c0_i32_0 : i32, i32
  }
  func.func @transform_14(%arg0: i32) -> (i32, i32) {
    %c0_i32 = arith.constant 0 : i32
    %c0_i32_0 = arith.constant 0 : i32
    %c0_i32_1 = arith.constant 0 : i32
    return %c0_i32, %c0_i32_0 : i32, i32
  }
  func.func @transform_15(%arg0: i32) -> (i32, i32) {
    %c0_i32 = arith.constant 0 : i32
    %c0_i32_0 = arith.constant 0 : i32
    %c0_i32_1 = arith.constant 0 : i32
    return %c0_i32, %c0_i32_0 : i32, i32
  }
  func.func @transform_16(%arg0: i32) -> (i32, i32) {
    %c0_i32 = arith.constant 0 : i32
    %c0_i32_0 = arith.constant 0 : i32
    %c0_i32_1 = arith.constant 0 : i32
    return %c0_i32, %c0_i32_0 : i32, i32
  }
  func.func @transform_17(%arg0: i32) -> (i32, i32) {
    %c0_i32 = arith.constant 0 : i32
    %c0_i32_0 = arith.constant 0 : i32
    return %arg0, %c0_i32 : i32, i32
  }
}

</mosaic_0001>

<bundles_post_ra>
// kernel: tpu_custom_call.1
= control target key start
LH: loop header
LB: loop body
LE: loop exit
PB: predicated region body
PF: predicated region fallthrough
CT: control target
= control target key end

     0   :  { %s1276_s0 = inlined_call_operand.vmem [shape: f32[8,64], index: 0, kind: input, shape index: {}]   ;;  %s1277_s1 = inlined_call_operand.vmem [shape: f32[1,64], index: 1, kind: input, shape index: {}]   ;;  %s1278_s2 = inlined_call_operand.vmem [shape: f32[1,64], index: 2, kind: input, shape index: {}]   ;;  %s1279_s3 = inlined_call_operand.vmem [shape: f32[64,56], index: 3, kind: input, shape index: {}]   ;;  %s1280_s4 = inlined_call_operand.vmem [shape: f32[1,56], index: 4, kind: input, shape index: {}]   ;;  %s1281_s5 = inlined_call_operand.vmem [shape: f32[56,112], index: 5, kind: input, shape index: {}]   ;;  %s1282_s6 = inlined_call_operand.vmem [shape: f32[1,112], index: 6, kind: input, shape index: {}]   ;;  %s1283_s7 = inlined_call_operand.vmem [shape: f32[112,224], index: 7, kind: input, shape index: {}]   ;;  %s1284_s8 = inlined_call_operand.vmem [shape: f32[1,224], index: 8, kind: input, shape index: {}]   ;;  %s1285_s9 = inlined_call_operand.vmem [shape: f32[224,32], index: 9, kind: input, shape index: {}]   ;;  %s1286_s10 = inlined_call_operand.vmem [shape: f32[1,32], index: 10, kind: input, shape index: {}]   ;;  %s1287_s11 = inlined_call_operand.vmem [shape: f32[1,32], index: 11, kind: input, shape index: {}]   ;;  %s1288_s12 = inlined_call_operand.vmem [shape: f32[1,32], index: 12, kind: input, shape index: {}]   ;;  %s1289_s13 = inlined_call_operand.vmem [shape: f32[32,32], index: 13, kind: input, shape index: {}]   ;;  %s1290_s14 = inlined_call_operand.vmem [shape: f32[1,32], index: 14, kind: input, shape index: {}]   ;;  %s1291_s15 = inlined_call_operand.vmem [shape: f32[1,32], index: 15, kind: input, shape index: {}]   ;;  %s1292_s16 = inlined_call_operand.vmem [shape: f32[1,32], index: 16, kind: input, shape index: {}]   ;;  %s1293_s17 = inlined_call_operand.hbm [shape: f32[8,32], index: 17, kind: output, shape index: {}]  }
   0x1   :  { %1294 = sst [smem:[#allocation5_spill]] %s1276_s0 }
   0x2   :  { %1295 = sst [smem:[#allocation6_spill]] %s1277_s1 }
   0x3   :  { %s1296_s26 = sld [smem:[#allocation5_spill]]  ;;  %vm58_vm0 = vcmask 523264  }
   0x9   :  { %v57_v0 = vld [vmem:[%s1296_s26] sm:$0xff] }
   0xa   :  { %22 = vsyncpa [#allocation3], 0  ;;  %v59_v1 = vsel %vm58_vm0, %v57_v0, 0.0  ;;  %v89_v7 = vld [vmem:[%s1279_s3] sm:$0xff]  ;;  %v90_v8 = vld [vmem:[%s1279_s3 + $0x8] sm:$0xff]  ;;  %v869_v12 = vmov 0.0|0.0  }
   0xb   :  { %60 = vadd.xlane.f32.xlu0 %v59_v1  ;;  %v739_v9 = vpack.c.bf16 %v90_v8, %v89_v7  ;;  %v91_v10 = vld [vmem:[%s1279_s3 + $0x10] sm:$0xff]  ;;  %v92_v11 = vld [vmem:[%s1279_s3 + $0x18] sm:$0xff]  ;;  %738 = vmatprep.subr.bf16.mxu1 %v869_v12  ;;  %vm870_vm1 = vmmov 0   ;;  %v871_v13 = vmov 0.0   ;;  %v93_v15 = vld [vmem:[%s1279_s3 + $0x20] sm:$0xff]  ;;  %s1297_s0 = sld [smem:[#allocation6_spill]] }
   0xc   :  { %707 = vmatprep.mubr.msk.f32.mxu1 %vm870_vm1, %v871_v13  ;;  %v742_v14 = vpack.c.bf16 %v92_v11, %v91_v10  ;;  %787 = vmatprep.subr.bf16.mxu0 %v869_v12  ;;  %v94_v16 = vld [vmem:[%s1279_s3 + $0x28] sm:$0xff]  ;;  %v95_v18 = vld [vmem:[%s1279_s3 + $0x30] sm:$0xff]  ;;  %v96_v19 = vld [vmem:[%s1279_s3 + $0x38] sm:$0xff]  ;;  %vm192_vm2 = vcmask 457728   ;;  %vm307_vm3 = vcmask 916480   ;;  %vm419_vm4 = vcmask 785408  }
   0xd   :  { %740 = vmatpush3.bf16.msra.mxu1 %v739_v9  ;;  %v745_v17 = vpack.c.bf16 %v94_v16, %v93_v15  ;;  %v748_v20 = vpack.c.bf16 %v96_v19, %v95_v18  ;;  %v178_v27 = vld [vmem:[%s1281_s5] sm:$0xff]  ;;  %v179_v28 = vld [vmem:[%s1281_s5 + $0x8] sm:$0xff]  ;;  %v180_v33 = vld [vmem:[%s1281_s5 + $0x10] sm:$0xff]  ;;  %vm494_vm5 = vcmask 261120  }
   0xe   :  { %741 = vmatprep.subr.bf16.mxu1 %v869_v12  ;;  %v655_v29 = vld [vmem:[%s1278_s2] ss:$0 sm:$0xff]  ;;  %v751_v31 = vpack.c.bf16 %v179_v28, %v178_v27  ;;  %v181_v34 = vld [vmem:[%s1281_s5 + $0x18] sm:$0xff]  ;;  %v183_v37 = vld [vmem:[%s1281_s5 + $0x28] sm:$0xff]  ;;  %s872_s2 = smov [#allocation2]  }
   0xf   :  { %v754_v35 = vpack.c.bf16 %v181_v34, %v180_v33  ;;  %v182_v36 = vld [vmem:[%s1281_s5 + $0x20] sm:$0xff]  ;;  %v184_v39 = vld [vmem:[%s1281_s5 + $0x30] sm:$0xff]  ;;  %v268_v40 = vld [vmem:[%s1283_s7 + $0x8] sm:$0xff]  ;;  %s646_s25 = sshll.u32 %s872_s2, 4  ;;  %s647_s25 = int_to_ptr.vmem [resolvable:$true] %s646_s25 }
  0x10   :  { %v757_v38 = vpack.c.bf16 %v183_v37, %v182_v36  ;;  %v270_v41 = vld [vmem:[%s1283_s7 + $0x18] sm:$0xff]  ;;  %v656_v43 = vld [vmem:[%s1280_s4] ss:$0 sm:$0xff]  ;;  %v269_v45 = vld [vmem:[%s1283_s7 + $0x10] sm:$0xff]  ;;  %s845_s4 = scalar_lea.vmem %s647_s25, 128  ;;  %p850_p1 = scmp.lt.s32.totalorder %s647_s25, %s647_s25 }
  0x11   :  { %743 = vmatpush3.bf16.msra.mxu1 %v742_v14  ;;  %v654_v25 = vld [vmem:[%s1297_s0] ss:$0 sm:$0xff]  ;;  %v759_v42 = vpack.c.bf16 %v270_v41, %v268_v40  ;;  %v272_v47 = vld [vmem:[%s1283_s7 + $0x28] sm:$0xff]  ;;  %v274_v48 = vld [vmem:[%s1283_s7 + $0x38] sm:$0xff]  ;;  %p846_p0 = scmp.ne.s32.totalorder %s647_s25, %s845_s4  ;;  %p851_p2 = scmp.lt.s32.totalorder %s845_s4, %s845_s4 }
  0x12   :  { %744 = vmatprep.subr.bf16.mxu1 %v869_v12  ;;  %v267_v44 = vld [vmem:[%s1283_s7] sm:$0xff]  ;;  %v763_v53 = vpack.c.bf16 %v274_v48, %v272_v47  ;;  %v273_v55 = vld [vmem:[%s1283_s7 + $0x30] sm:$0xff]  ;;  %v276_v56 = vld [vmem:[%s1283_s7 + $0x48] sm:$0xff] }
  0x13   :  { %v761_v51 = vpack.c.bf16 %v269_v45, %v267_v44  ;;  %v271_v54 = vld [vmem:[%s1283_s7 + $0x20] sm:$0xff]  ;;  %v278_v57 = vld [vmem:[%s1283_s7 + $0x58] sm:$0xff]  ;;  %v277_v61 = vld [vmem:[%s1283_s7 + $0x50] sm:$0xff]  ;;  %p852_p3 = por %p851_p2, %p850_p1 }
  0x14   :  { %v765_v58 = vpack.c.bf16 %v273_v55, %v271_v54  ;;  %v767_v59 = vpack.c.bf16 %v278_v57, %v276_v56  ;;  %v275_v60 = vld [vmem:[%s1283_s7 + $0x40] sm:$0xff]  ;;  %v280_v62 = vld [vmem:[%s1283_s7 + $0x68] sm:$0xff]  ;;  %v282_v63 = vld [vmem:[%s1283_s7 + $0x78] sm:$0xff] }
  0x15   :  { %746 = vmatpush3.bf16.msra.mxu1 %v745_v17  ;;  %v771_v1 = vpack.c.bf16 %v282_v63, %v280_v62  ;;  %v283_v8 = vld [vmem:[%s1283_s7 + $0x80] sm:$0xff]  ;;  %v285_v9 = vld [vmem:[%s1283_s7 + $0x90] sm:$0xff]  ;;  %v288_v10 = vld [vmem:[%s1283_s7 + $0xa8] sm:$0xff]  ;;  %p853_p4 = pnand %p852_p3, %p846_p0 }
  0x16   :  { %747 = vmatprep.subr.bf16.mxu1 %v869_v12  ;;  %v290_v11 = vld [vmem:[%s1283_s7 + $0xb8] sm:$0xff]  ;;  %v777_v14 = vpack.c.bf16 %v285_v9, %v283_v8  ;;  %v287_v16 = vld [vmem:[%s1283_s7 + $0xa0] sm:$0xff]  ;;  %v289_v17 = vld [vmem:[%s1283_s7 + $0xb0] sm:$0xff]  ;;  %v297_v8 = vlaneseq }
  0x17   :  { %v779_v15 = vpack.c.bf16 %v290_v11, %v288_v10  ;;  %v781_v18 = vpack.c.bf16 %v289_v17, %v287_v16  ;;  %v292_v19 = vld [vmem:[%s1283_s7 + $0xc8] sm:$0xff]  ;;  %v386_v27 = vld [vmem:[%s1285_s9 + $0x10] sm:$0xff]  ;;  %v392_v37 = vld [vmem:[%s1285_s9 + $0x40] sm:$0xff] }
  0x18   :  { %v390_v34 = vld [vmem:[%s1285_s9 + $0x30] sm:$0xff]  ;;  %v395_v41 = vld [vmem:[%s1285_s9 + $0x58] sm:$0xff]  ;;  %v397_v44 = vld [vmem:[%s1285_s9 + $0x68] sm:$0xff]  ;;  %v298_v9 = vshrl.u32 %v297_v8, 7 }
  0x19   :  { %749 = vmatpush3.bf16.msra.mxu1 %v748_v20  ;;  %v294_v20 = vld [vmem:[%s1283_s7 + $0xd8] sm:$0xff]  ;;  %v394_v40 = vld [vmem:[%s1285_s9 + $0x50] sm:$0xff]  ;;  %v404_v55 = vld [vmem:[%s1285_s9 + $0xa0] sm:$0xff] }
  0x1a   :  { %750 = vmatprep.subr.bf16.mxu1 %v869_v12  ;;  %v399_v47 = vld [vmem:[%s1285_s9 + $0x78] sm:$0xff]  ;;  %v405_v56 = vld [vmem:[%s1285_s9 + $0xa8] sm:$0xff]  ;;  %v299_v10 = vsub.s32 0, %v298_v9  ;;  %v295_v11 = vld [vmem:[%s1284_s8] sm:$0x3] }
  0x1b   :  { %v818_v57 = vpack.c.bf16 %v405_v56, %v404_v55 }
  0x98   :  { %v61_v2 = vpop.xlane.xlu0 %60 }
  0x99   :  { %v63_v3 = vmul.f32 0.015625, %v61_v2  ;;  %v279_v2 = vld [vmem:[%s1283_s7 + $0x60] sm:$0xff] }
  0x9b   :  { %v64_v4 = vsub.f32 %v57_v0, %v63_v3  ;;  %v769_v0 = vpack.c.bf16 %v277_v61, %v275_v60  ;;  %v281_v3 = vld [vmem:[%s1283_s7 + $0x70] sm:$0xff]  ;;  %v658_v61 = vld [vmem:[%s1282_s6] ss:$0 sm:$0xff] }
  0x9d   :  { %v65_v5 = vmul.f32 %v64_v4, %v64_v4 }
  0x9f   :  { %v66_v6 = vsel %vm58_vm0, %v65_v5, 0.0  ;;  %v286_v5 = vld [vmem:[%s1283_s7 + $0x98] sm:$0xff] }
  0xa0   :  { %67 = vadd.xlane.f32.xlu0 %v66_v6  ;;  %v773_v6 = vpack.c.bf16 %v281_v3, %v279_v2  ;;  %v408_v2 = vld [vmem:[%s1285_s9 + $0xc0] sm:$0xff]  ;;  %v409_v3 = vld [vmem:[%s1285_s9 + $0xc8] sm:$0xff] }
 0x12d   :  { %v68_v21 = vpop.xlane.xlu0 %67 }
 0x12e   :  { %v69_v22 = vmul.f32 0.015625, %v68_v21  ;;  %v783_v21 = vpack.c.bf16 %v294_v20, %v292_v19 }
 0x130   :  { %v70_v23 = vadd.f32 1e-05, %v69_v22  ;;  %v291_v22 = vld [vmem:[%s1283_s7 + $0xc0] sm:$0xff] }
 0x132   :  { %839 = vrsqrt.f32 %v70_v23  ;;  %v293_v23 = vld [vmem:[%s1283_s7 + $0xd0] sm:$0xff] }
 0x13c   :  { %v840_v24 = vpop.eup %839 }
 0x13d   :  { %v72_v26 = vmul.f32 %v840_v24, %v64_v4  ;;  %v284_v4 = vld [vmem:[%s1283_s7 + $0x88] sm:$0xff]  ;;  %v785_v24 = vpack.c.bf16 %v293_v23, %v291_v22  ;;  %v661_v23 = vld [vmem:[%s1286_s10] ss:$0 sm:$0xff] }
 0x13e   :  { %v775_v7 = vpack.c.bf16 %v286_v5, %v284_v4  ;;  %v824_v4 = vpack.c.bf16 %v409_v3, %v408_v2  ;;  %v410_v5 = vld [vmem:[%s1285_s9 + $0xd0] sm:$0xff] }
 0x13f   :  { %v80_v30 = vmul.f32 %v654_v25, %v72_v26  ;;  %v384_v25 = vld [vmem:[%s1285_s9] sm:$0xff]  ;;  %v385_v26 = vld [vmem:[%s1285_s9 + $0x8] sm:$0xff] }
 0x140   :  { %v788_v28 = vpack.c.bf16 %v385_v26, %v384_v25 }
 0x141   :  { %v88_v32 = vadd.f32 %v655_v29, %v80_v30  ;;  %v387_v29 = vld [vmem:[%s1285_s9 + $0x18] sm:$0xff] }
 0x142   :  { %789 = vmatpush1.bf16.msra.mxu0 %v788_v28  ;;  %v791_v30 = vpack.c.bf16 %v387_v29, %v386_v27 }
 0x143   :  { %708 = vmatmul.mubr.msk.f32.vlgmr.msra.gmra.mrb[0].mxu1 %vm58_vm0, %v88_v32  ;;  %790 = vmatprep.subr.bf16.mxu0 %v869_v12  ;;  %v389_v32 = vld [vmem:[%s1285_s9 + $0x28] sm:$0xff] }
 0x144   :  { %752 = vmatpush3.bf16.msra.mxu1 %v751_v31  ;;  %724 = vmatprep.mubr.msk.f32.mxu1 %vm870_vm1, %v871_v13  ;;  %v388_v31 = vld [vmem:[%s1285_s9 + $0x20] sm:$0xff] }
 0x145   :  { %753 = vmatprep.subr.bf16.mxu1 %v869_v12  ;;  %v794_v33 = vpack.c.bf16 %v389_v32, %v388_v31 }
 0x146   :  { %792 = vmatpush1.bf16.msra.mxu0 %v791_v30 }
 0x147   :  { %793 = vmatprep.subr.bf16.mxu0 %v869_v12 }
 0x148   :  { %755 = vmatpush3.bf16.msra.mxu1 %v754_v35  ;;  %v391_v35 = vld [vmem:[%s1285_s9 + $0x38] sm:$0xff] }
 0x149   :  { %756 = vmatprep.subr.bf16.mxu1 %v869_v12  ;;  %v797_v36 = vpack.c.bf16 %v391_v35, %v390_v34  ;;  %v526_v34 = vld [vmem:[%s1289_s13 + $0x8] sm:$0xff] }
 0x14a   :  { %795 = vmatpush1.bf16.msra.mxu0 %v794_v33 }
 0x14b   :  { %796 = vmatprep.subr.bf16.mxu0 %v869_v12 }
 0x14c   :  { %758 = vmatpush3.bf16.msra.mxu1 %v757_v38  ;;  %v393_v38 = vld [vmem:[%s1285_s9 + $0x48] sm:$0xff] }
 0x14d   :  { %722 = vmatprep.subr.mxu1 %v871_v13 }
 0x14e   :  { %798 = vmatpush1.bf16.msra.mxu0 %v797_v36  ;;  %v527_v36 = vld [vmem:[%s1289_s13 + $0x10] sm:$0xff] }
 0x14f   :  { %799 = vmatprep.subr.bf16.mxu0 %v869_v12 }
 0x150   :  { %723 = vmatpush3.msra.mxu1 %v184_v39  ;;  %v800_v39 = vpack.c.bf16 %v393_v38, %v392_v37  ;;  %v528_v37 = vld [vmem:[%s1289_s13 + $0x18] sm:$0xff] }
 0x151   :  { %760 = vmatprep.subr.bf16.mxu1 %v759_v42  ;;  %v803_v42 = vpack.c.bf16 %v395_v41, %v394_v40  ;;  %v833_v38 = vpack.c.bf16 %v528_v37, %v527_v36 }
 0x152   :  { %801 = vmatpush1.bf16.msra.mxu0 %v800_v39 }
 0x153   :  { %802 = vmatprep.subr.bf16.mxu0 %v869_v12 }
 0x156   :  { %804 = vmatpush1.bf16.msra.mxu0 %v803_v42 }
 0x157   :  { %805 = vmatprep.subr.bf16.mxu0 %v869_v12 }
 0x216   :  { %v173_v46 = vpop.f32.mrb[0].mxu1 }
 0x217   :  { %v174_v49 = vadd.f32 %v656_v43, %v173_v46  ;;  %v709_v50 = vpop.f32.mrb[1].mxu1  ;;  %v396_v43 = vld [vmem:[%s1285_s9 + $0x60] sm:$0xff]  ;;  %v398_v46 = vld [vmem:[%s1285_s9 + $0x70] sm:$0xff] }
 0x218   :  { %v806_v45 = vpack.c.bf16 %v397_v44, %v396_v43  ;;  %v809_v48 = vpack.c.bf16 %v399_v47, %v398_v46  ;;  %v401_v50 = vld [vmem:[%s1285_s9 + $0x88] sm:$0xff]  ;;  %v663_v43 = vld [vmem:[%s1287_s11] ss:$0 sm:$0xff] }
 0x219   :  { %v177_v52 = vmax.f32 %v174_v49, 0.0  ;;  %v400_v49 = vld [vmem:[%s1285_s9 + $0x80] sm:$0xff] }
 0x21a   :  { %807 = vmatpush1.bf16.msra.mxu0 %v806_v45  ;;  %v664_v44 = vld [vmem:[%s1288_s12] ss:$0 sm:$0xff] }
 0x21b   :  { %725 = vmatmul.mubr.msk.f32.vlgmr.msra.gmra.mrb[2].mxu1 %vm192_vm2, %v177_v52  ;;  %808 = vmatprep.subr.bf16.mxu0 %v869_v12  ;;  %v402_v52 = vld [vmem:[%s1285_s9 + $0x90] sm:$0xff]  ;;  %v665_v47 = vld [vmem:[%s1290_s14] ss:$0 sm:$0xff] }
 0x21c   :  { %762 = vmatpush1.bf16.msra.mxu1 %v761_v51  ;;  %375 = vmatprep.mubr.f32.mxu1 %v871_v13  ;;  %v812_v51 = vpack.c.bf16 %v401_v50, %v400_v49 }
 0x21d   :  { %764 = vmatprep.subr.bf16.mxu1 %v763_v53  ;;  %v403_v53 = vld [vmem:[%s1285_s9 + $0x98] sm:$0xff] }
 0x21e   :  { %810 = vmatpush1.bf16.msra.mxu0 %v809_v48  ;;  %v815_v54 = vpack.c.bf16 %v403_v53, %v402_v52 }
 0x21f   :  { %811 = vmatprep.subr.bf16.mxu0 %v869_v12 }
 0x220   :  { %766 = vmatpush1.bf16.msra.mxu1 %v765_v58  ;;  %v406_v58 = vld [vmem:[%s1285_s9 + $0xb0] sm:$0xff] }
 0x221   :  { %768 = vmatprep.subr.bf16.mxu1 %v767_v59  ;;  %v407_v59 = vld [vmem:[%s1285_s9 + $0xb8] sm:$0xff] }
 0x222   :  { %813 = vmatpush1.bf16.msra.mxu0 %v812_v51  ;;  %v821_v60 = vpack.c.bf16 %v407_v59, %v406_v58 }
 0x223   :  { %814 = vmatprep.subr.bf16.mxu0 %v869_v12 }
 0x224   :  { %770 = vmatpush1.bf16.msra.mxu1 %v769_v0 }
 0x225   :  { %772 = vmatprep.subr.bf16.mxu1 %v771_v1 }
 0x226   :  { %816 = vmatpush1.bf16.msra.mxu0 %v815_v54 }
 0x227   :  { %817 = vmatprep.subr.bf16.mxu0 %v869_v12 }
 0x228   :  { %774 = vmatpush1.bf16.msra.mxu1 %v773_v6  ;;  %v411_v6 = vld [vmem:[%s1285_s9 + $0xd8] sm:$0xff] }
 0x229   :  { %776 = vmatprep.subr.bf16.mxu1 %v775_v7  ;;  %v827_v7 = vpack.c.bf16 %v411_v6, %v410_v5 }
 0x22a   :  { %819 = vmatpush1.bf16.msra.mxu0 %v818_v57 }
 0x22b   :  { %820 = vmatprep.subr.bf16.mxu0 %v869_v12 }
 0x22c   :  { %778 = vmatpush1.bf16.msra.mxu1 %v777_v14  ;;  %v303_v14 = vsub.s32 1, %v298_v9 }
 0x22d   :  { %780 = vmatprep.subr.bf16.mxu1 %v779_v15  ;;  %v300_v15 = vrot.slane %v295_v11, %v299_v10 }
 0x22e   :  { %822 = vmatpush1.bf16.msra.mxu0 %v821_v60  ;;  %v304_v16 = vrot.slane %v295_v11, %v303_v14 }
 0x22f   :  { %823 = vmatprep.subr.bf16.mxu0 %v869_v12 }
 0x230   :  { %782 = vmatpush1.bf16.msra.mxu1 %v781_v18 }
 0x231   :  { %784 = vmatprep.subr.bf16.mxu1 %v783_v21 }
 0x232   :  { %825 = vmatpush1.bf16.msra.mxu0 %v824_v4 }
 0x233   :  { %826 = vmatprep.subr.bf16.mxu0 %v869_v12 }
 0x234   :  { %786 = vmatpush1.bf16.msra.mxu1 %v785_v24 }
 0x236   :  { %828 = vmatpush1.bf16.msra.mxu0 %v827_v7 }
 0x237   :  { %829 = vmatprep.subr.bf16.mxu0 %v869_v12 }
 0x2ee   :  { %v262_v62 = vpop.f32.mrb[2].mxu1 }
 0x2ef   :  { %v263_v63 = vadd.f32 %v658_v61, %v262_v62  ;;  %v726_v0 = vpop.f32.mrb[3].mxu1  ;;  %v667_v62 = vld [vmem:[%s1291_s15] ss:$0 sm:$0xff] }
 0x2f0   :  { %v668_v0 = vld [vmem:[%s1292_s16] ss:$0 sm:$0xff] }
 0x2f1   :  { %v266_v1 = vmax.f32 %v263_v63, 0.0 }
 0x2f3   :  { %660 = vmatmul.mubr.msk.f32.vlgmr.msra.gmra.mrb[4].mxu1 %vm307_vm3, %v266_v1 }
 0x3c6   :  { %v377_v17 = vpop.f32.mrb[4].mxu1 }
 0x3c7   :  { %v378_v18 = vadd.f32 %v377_v17, %v300_v15  ;;  %v379_v19 = vpop.f32.mrb[5].mxu1 }
 0x3c8   :  { %v380_v20 = vadd.f32 %v379_v19, %v304_v16 }
 0x3c9   :  { %v382_v22 = vmax.f32 %v378_v18, 0.0 }
 0x3ca   :  { %v383_v21 = vmax.f32 %v380_v20, 0.0 }
 0x3cc   :  { %662 = vmatprep.mubr.msk.f32.mxu0 %vm419_vm4, %v383_v21 }
 0x3cd   :  { %488 = vmatmul.mubr.f32.vlgmr.msra.gmra.mrb[0].mxu0 %v382_v22 }
 0x3ce   :  { %735 = vmatprep.mubr.msk.f32.mxu0 %vm870_vm1, %v871_v13  ;;  %v525_v13 = vld [vmem:[%s1289_s13] sm:$0xff] }
 0x3cf   :  { %v830_v35 = vpack.c.bf16 %v526_v34, %v525_v13 }
 0x3d1   :  { %831 = vmatpush3.bf16.msra.mxu0 %v830_v35 }
 0x3d2   :  { %832 = vmatprep.subr.bf16.mxu0 %v869_v12 }
 0x3d5   :  { %834 = vmatpush3.bf16.msra.mxu0 %v833_v38 }
 0x4a0   :  { %v489_v24 = vpop.f32.mrb[0].mxu0 }
 0x4a1   :  { %v490_v25 = vadd.f32 %v661_v23, %v489_v24  ;;  %v491_v26 = vpop.f32.mrb[1].mxu0 }
 0x4a3   :  { %v493_v27 = vmax.f32 %v490_v25, 0.0 }
 0x4a5   :  { %v495_v28 = vsel %vm494_vm5, %v493_v27, 0.0 }
 0x4a6   :  { %496 = vadd.xlane.f32.xlu1 %v495_v28 }
 0x533   :  { %v497_v29 = vpop.xlane.xlu1 %496 }
 0x534   :  { %v499_v30 = vmul.f32 0.03125, %v497_v29 }
 0x536   :  { %v500_v31 = vsub.f32 %v493_v27, %v499_v30 }
 0x538   :  { %v501_v32 = vmul.f32 %v500_v31, %v500_v31 }
 0x53a   :  { %v502_v33 = vsel %vm494_vm5, %v501_v32, 0.0 }
 0x53b   :  { %503 = vadd.xlane.f32.xlu1 %v502_v33 }
 0x5c8   :  { %v504_v39 = vpop.xlane.xlu1 %503 }
 0x5c9   :  { %v505_v40 = vmul.f32 0.03125, %v504_v39 }
 0x5cb   :  { %v506_v41 = vadd.f32 1e-05, %v505_v40 }
 0x5cd   :  { %841 = vrsqrt.f32 %v506_v41 }
 0x5d7   :  { %v842_v42 = vpop.eup %841 }
 0x5d8   :  { %v508_v12 = vmul.f32 %v842_v42, %v500_v31 }
 0x5da   :  { %v516_v45 = vmul.f32 %v663_v43, %v508_v12 }
 0x5dc   :  { %v524_v46 = vadd.f32 %v664_v44, %v516_v45 }
 0x5de   :  { %736 = vmatmul.mubr.msk.f32.vlgmr.msra.gmra.mrb[2].mxu0 %vm494_vm5, %v524_v46 }
 0x6b1   :  { %v605_v48 = vpop.f32.mrb[2].mxu0 }
 0x6b2   :  { %v606_v49 = vadd.f32 %v665_v47, %v605_v48  ;;  %v737_v50 = vpop.f32.mrb[3].mxu0 }
 0x6b4   :  { %v609_v51 = vmax.f32 %v606_v49, 0.0 }
 0x6b6   :  { %v610_v52 = vsel %vm494_vm5, %v609_v51, 0.0 }
 0x6b7   :  { %611 = vadd.xlane.f32.xlu0 %v610_v52 }
 0x744   :  { %v612_v53 = vpop.xlane.xlu0 %611 }
 0x745   :  { %v613_v54 = vmul.f32 0.03125, %v612_v53 }
 0x747   :  { %v614_v55 = vsub.f32 %v609_v51, %v613_v54 }
 0x749   :  { %v615_v56 = vmul.f32 %v614_v55, %v614_v55 }
 0x74b   :  { %v616_v57 = vsel %vm494_vm5, %v615_v56, 0.0 }
 0x74c   :  { %617 = vadd.xlane.f32.xlu1 %v616_v57 }
 0x7d9   :  { %v618_v58 = vpop.xlane.xlu1 %617 }
 0x7da   :  { %v619_v59 = vmul.f32 0.03125, %v618_v58 }
 0x7dc   :  { %v620_v60 = vadd.f32 1e-05, %v619_v59 }
 0x7de   :  { %843 = vrsqrt.f32 %v620_v60 }
 0x7e8   :  { %v844_v61 = vpop.eup %843 }
 0x7e9   :  { %v622_v63 = vmul.f32 %v844_v61, %v614_v55 }
 0x7eb   :  { %v630_v1 = vmul.f32 %v667_v62, %v622_v63 }
 0x7ed   :  { %v638_v2 = vadd.f32 %v668_v0, %v630_v1 }
 0x7ef   :  { %639 = vst.msk [vmem:[#allocation2] sm:$0xff] %vm494_vm5, %v638_v2 }
 0x7f0   :  { %856 = shalt.err (!%p853_p4)
}
 0x7f1   :  { %s857_s26 = scalar_lea.hbm %s1293_s17, 128 }
 0x7f2   :  { %p858_p5 = scmp.ne.s32.totalorder %s1293_s17, %s857_s26  ;;  %p861_p6 = scmp.lt.u32.totalorder %s857_s26, %s1293_s17 }
 0x7f4   :  { %p863_p7 = pnand %p861_p6, %p858_p5 }
 0x7f6   :  { %866 = shalt.err (!%p863_p7)
}
 0x7f7   :  { %649 = dma.vmem_to_hbm [thread:$0]  %s647_s25, 128, %s1293_s17, [#allocation3]  }
 0x7f8   :  { %867 = dma.done.wait [#allocation3], 128  }
 0x7f9   :  { %868 = vsyncadd [#allocation3], 4294967168 }
 0x7fa   :  { %653 = vsyncpa [#allocation3], 1 }

</bundles_post_ra>
